<compile_context>
chip_gen: v7x
topology: tpu7x:2x2x1
jax: 0.10.0
libtpu: 0.0.40
codegen_flags: <defaults>
</compile_context>

<pallas_src>
import jax
import jax.numpy as jnp
from jax.experimental import pallas as pl
from jax.experimental.pallas import tpu as pltpu


def _pick_tm(m_pad):
    """Row-tile (lane) size. m_pad is a multiple of 128.

    Small M: one full-array step (avoids ~0.35us/step overhead, nothing to
    parallelize anyway).  Large M: biggest tile that divides m_pad and leaves
    >= 2 steps so the 'parallel' grid axis can feed both v7x TensorCores.
    """
    if m_pad <= 512:
        return m_pad
    for tm in (2048, 1024, 512, 256, 128):
        if m_pad % tm == 0 and m_pad // tm >= 2:
            return tm
    return 128  # unreachable: m_pad is a multiple of 128


def _tap_max(ref):
    """Pairwise-tree max over the leading tap axis of a (k, C, TM) block."""
    taps = [ref[t] for t in range(ref.shape[0])]
    while len(taps) > 1:
        nxt = []
        for i in range(0, len(taps), 2):
            if i + 1 < len(taps):
                nxt.append(jnp.maximum(taps[i], taps[i + 1]))
            else:
                nxt.append(taps[i])
        taps = nxt
    return taps[0]


def _encoderx2_kernel(xw_ref, x1w_ref, w1_ref, b1_ref, w2_ref, b2_ref, o_ref):
    # Remaining (H-direction) window max, lane-dense (C, TM) tiles on the VPU.
    m1 = _tap_max(xw_ref)     # (C1, TM)   branch 1: MaxPool2d(4), 4 H-taps
    m2 = _tap_max(x1w_ref)    # (C2, TM)   branch 2: MaxPool2d(2), 2 H-taps

    # 1x1 convs as (co2, C) @ (C, TM) MXU matmuls with f32 accumulation;
    # bias broadcast along lanes.  Stores are full (co2, TM) blocks into one
    # contiguous (2, co2, TM) output slab == torch.cat dim=1 order.
    o_ref[0] = (jnp.dot(w1_ref[...], m1, preferred_element_type=jnp.float32)
                + b1_ref[...])
    o_ref[1] = (jnp.dot(w2_ref[...], m2, preferred_element_type=jnp.float32)
                + b2_ref[...])


def _pool_prep(t, k, m_pad):
    """NCHW -> lane-dense tap slab (k, C, m_pad).

    The W-direction window max is folded into this single wrapper pass, so the
    materialized intermediate is k-times smaller than a full tap slab; only
    the H-direction (k taps) max remains for the kernel.  Rows are flattened
    as n*Ho*Wo (lane dim) and padded to a multiple of 128 lanes.
    """
    n, c, h, w = t.shape
    oh, ow = h // k, w // k
    t = t[:, :, : oh * k, : ow * k].astype(jnp.float32)       # floor crop (PyTorch)
    t = t.reshape(n, c, oh * k, ow, k).max(axis=-1)           # W-window max
    t = t.reshape(n, c, oh, k, ow)
    t = jnp.transpose(t, (3, 1, 0, 2, 4))                     # (k, C, N, oh, ow)
    t = t.reshape(k, c, n * oh * ow)
    m = n * oh * ow
    if m_pad > m:
        t = jnp.pad(t, ((0, 0), (0, 0), (0, m_pad - m)))      # padded lanes discarded
    return t


def encoderx2_forward(x, x1c, params):
    n, c1, h, w = x.shape
    _, c2, h2, w2 = x1c.shape
    co2 = params['w1'].shape[0]                                # out_ch // 2
    out_ch = 2 * co2

    ho, wo = h // 4, w // 4
    assert (ho, wo) == (h2 // 2, w2 // 2), "branches must pool to the same spatial size"

    m = n * ho * wo
    m_pad = max(128, ((m + 127) // 128) * 128)                 # lane-align row count
    tm = _pick_tm(m_pad)
    grid = (m_pad // tm,)

    xw = _pool_prep(x, 4, m_pad)                               # (4, C1, m_pad)
    x1w = _pool_prep(x1c, 2, m_pad)                            # (2, C2, m_pad)

    out2 = pl.pallas_call(
        _encoderx2_kernel,
        out_shape=jax.ShapeDtypeStruct((2, co2, m_pad), jnp.float32),
        grid=grid,
        in_specs=[
            pl.BlockSpec((4, c1, tm), lambda i: (0, 0, i)),    # branch-1 H-taps
            pl.BlockSpec((2, c2, tm), lambda i: (0, 0, i)),    # branch-2 H-taps
            pl.BlockSpec((co2, c1), lambda i: (0, 0)),         # w1 (out, in)
            pl.BlockSpec((co2, 1), lambda i: (0, 0)),          # b1
            pl.BlockSpec((co2, c2), lambda i: (0, 0)),         # w2 (out, in)
            pl.BlockSpec((co2, 1), lambda i: (0, 0)),          # b2
        ],
        out_specs=pl.BlockSpec((2, co2, tm), lambda i: (0, 0, i)),
        compiler_params=pltpu.CompilerParams(
            dimension_semantics=("parallel",),                 # row tiles are independent
            # no vmem_limit_bytes: per-step footprint is < 2 MiB double-buffered
        ),
    )(xw, x1w, params['w1'], params['b1'], params['w2'], params['b2'])

    # Assemble torch.cat([branch1, branch2], dim=1) and return NCHW.
    out = out2[:, :, :m].reshape(2, co2, n, ho, wo)
    out = jnp.transpose(out, (2, 0, 1, 3, 4)).reshape(n, out_ch, ho, wo)
    return out


def init_params(key, in_ch1, in_ch2, out_ch):
    # PyTorch Conv2d(in, out, 1) weight is (out, in, 1, 1); stored here as
    # (out, in) so the kernel computes y = W @ m on lane-dense (in, TM) tiles.
    co2 = out_ch // 2
    k1, k2, k3, k4 = jax.random.split(key, 4)
    return {
        'w1': jax.random.normal(k1, (co2, in_ch1), jnp.float32) * 0.2,
        'b1': jax.random.normal(k2, (co2, 1), jnp.float32) * 0.05,
        'w2': jax.random.normal(k3, (co2, in_ch2), jnp.float32) * 0.2,
        'b2': jax.random.normal(k4, (co2, 1), jnp.float32) * 0.05,
    }


def _reference(x, x1c, params):
    # pure-XLA reference for validation
    def pool(t, k):
        n, c, h, w = t.shape
        t = t[:, :, : (h // k) * k, : (w // k) * k]
        t = t.reshape(n, c, h // k, k, w // k, k)
        return t.max(axis=(3, 5))
    hi = jax.lax.Precision.HIGHEST
    p1 = pool(x.astype(jnp.float32), 4)
    p2 = pool(x1c.astype(jnp.float32), 2)
    y1 = jnp.einsum('nchw,dc->ndhw', p1, params['w1'], precision=hi) \
        + params['b1'][:, 0][None, :, None, None]
    y2 = jnp.einsum('nchw,dc->ndhw', p2, params['w2'], precision=hi) \
        + params['b2'][:, 0][None, :, None, None]
    return jnp.concatenate([y1, y2], axis=1)


if __name__ == "__main__":
    key = jax.random.PRNGKey(0)
    kx, kx1, kp = jax.random.split(key, 3)

    in_ch1, in_ch2, out_ch = 4, 8, 32
    x = jax.random.normal(kx, (2, in_ch1, 16, 16), jnp.float32)    # NCHW, full res
    x1c = jax.random.normal(kx1, (2, in_ch2, 8, 8), jnp.float32)   # NCHW, half res
    params = init_params(kp, in_ch1, in_ch2, out_ch)

    out = jax.jit(encoderx2_forward)(x, x1c, params)
    jax.block_until_ready(out)

    assert out.shape == (2, out_ch, 4, 4) and out.dtype == jnp.float32
    ref = _reference(x, x1c, params)
    assert jnp.allclose(out, ref, rtol=1e-4, atol=1e-4), "mismatch vs reference"
    print("KERNEL_OK")
</pallas_src>

<mosaic_0001>
module attributes {stable_mosaic.version = 11 : i64} {
  func.func @_encoderx2_kernel(%arg0: i32, %arg1: memref<4x4x128xf32, #tpu.memory_space<vmem>>, %arg2: memref<2x8x128xf32, #tpu.memory_space<vmem>>, %arg3: memref<16x4xf32, #tpu.memory_space<vmem>>, %arg4: memref<16x1xf32, #tpu.memory_space<vmem>>, %arg5: memref<16x8xf32, #tpu.memory_space<vmem>>, %arg6: memref<16x1xf32, #tpu.memory_space<vmem>>, %arg7: memref<2x16x128xf32, #tpu.memory_space<vmem>>) attributes {dimension_semantics = [#tpu.dimension_semantics<parallel>], iteration_bounds = array<i64: 1>, scalar_prefetch = 0 : i64, scratch_operands = 0 : i64, tpu.core_type = #tpu.core_type<tc>, window_params = [{transform_indices = @transform_0, window_bounds = array<i64: 4, 4, 128>}, {transform_indices = @transform_1, window_bounds = array<i64: 2, 8, 128>}, {pipeline_mode = #tpu.pipeline_mode<synchronous>, transform_indices = @transform_2, window_bounds = array<i64: 16, 4>}, {pipeline_mode = #tpu.pipeline_mode<synchronous>, transform_indices = @transform_3, window_bounds = array<i64: 16, 1>}, {pipeline_mode = #tpu.pipeline_mode<synchronous>, transform_indices = @transform_4, window_bounds = array<i64: 16, 8>}, {pipeline_mode = #tpu.pipeline_mode<synchronous>, transform_indices = @transform_5, window_bounds = array<i64: 16, 1>}, {transform_indices = @transform_6, window_bounds = array<i64: 2, 16, 128>}]} {
    %c0 = arith.constant 0 : index
    %c0_0 = arith.constant 0 : index
    %c0_1 = arith.constant 0 : index
    %0 = vector.load %arg1[%c0, %c0_0, %c0_1] : memref<4x4x128xf32, #tpu.memory_space<vmem>>, vector<1x4x128xf32>
    %1 = vector.shape_cast %0 : vector<1x4x128xf32> to vector<4x128xf32>
    %c1 = arith.constant 1 : index
    %c0_2 = arith.constant 0 : index
    %c0_3 = arith.constant 0 : index
    %2 = vector.load %arg1[%c1, %c0_2, %c0_3] : memref<4x4x128xf32, #tpu.memory_space<vmem>>, vector<1x4x128xf32>
    %3 = vector.shape_cast %2 : vector<1x4x128xf32> to vector<4x128xf32>
    %c2 = arith.constant 2 : index
    %c0_4 = arith.constant 0 : index
    %c0_5 = arith.constant 0 : index
    %4 = vector.load %arg1[%c2, %c0_4, %c0_5] : memref<4x4x128xf32, #tpu.memory_space<vmem>>, vector<1x4x128xf32>
    %5 = vector.shape_cast %4 : vector<1x4x128xf32> to vector<4x128xf32>
    %c3 = arith.constant 3 : index
    %c0_6 = arith.constant 0 : index
    %c0_7 = arith.constant 0 : index
    %6 = vector.load %arg1[%c3, %c0_6, %c0_7] : memref<4x4x128xf32, #tpu.memory_space<vmem>>, vector<1x4x128xf32>
    %7 = vector.shape_cast %6 : vector<1x4x128xf32> to vector<4x128xf32>
    %8 = arith.maximumf %1, %3 : vector<4x128xf32>
    %9 = arith.maximumf %5, %7 : vector<4x128xf32>
    %10 = arith.maximumf %8, %9 : vector<4x128xf32>
    %c0_8 = arith.constant 0 : index
    %c0_9 = arith.constant 0 : index
    %c0_10 = arith.constant 0 : index
    %11 = vector.load %arg2[%c0_8, %c0_9, %c0_10] : memref<2x8x128xf32, #tpu.memory_space<vmem>>, vector<1x8x128xf32>
    %12 = vector.shape_cast %11 : vector<1x8x128xf32> to vector<8x128xf32>
    %c1_11 = arith.constant 1 : index
    %c0_12 = arith.constant 0 : index
    %c0_13 = arith.constant 0 : index
    %13 = vector.load %arg2[%c1_11, %c0_12, %c0_13] : memref<2x8x128xf32, #tpu.memory_space<vmem>>, vector<1x8x128xf32>
    %14 = vector.shape_cast %13 : vector<1x8x128xf32> to vector<8x128xf32>
    %15 = arith.maximumf %12, %14 : vector<8x128xf32>
    %c0_14 = arith.constant 0 : index
    %c0_15 = arith.constant 0 : index
    %16 = vector.load %arg3[%c0_14, %c0_15] : memref<16x4xf32, #tpu.memory_space<vmem>>, vector<16x4xf32>
    %cst = arith.constant dense<0.000000e+00> : vector<16x128xf32>
    %17 = tpu.matmul %16, %10, %cst {dimension_numbers = #tpu.dot_dimension_numbers<[1], [0], [0], [1], [0, 0, 1, 1], [], []>} : vector<16x4xf32>, vector<4x128xf32>, vector<16x128xf32> -> vector<16x128xf32>
    %c0_16 = arith.constant 0 : index
    %c0_17 = arith.constant 0 : index
    %18 = vector.load %arg4[%c0_16, %c0_17] : memref<16x1xf32, #tpu.memory_space<vmem>>, vector<16x1xf32>
    %19 = vector.broadcast %18 : vector<16x1xf32> to vector<16x128xf32>
    %20 = arith.addf %17, %19 : vector<16x128xf32>
    %c0_18 = arith.constant 0 : index
    %c0_19 = arith.constant 0 : index
    %c0_20 = arith.constant 0 : index
    %21 = vector.load %arg7[%c0_18, %c0_19, %c0_20] : memref<2x16x128xf32, #tpu.memory_space<vmem>>, vector<1x16x128xf32>
    %22 = vector.shape_cast %21 : vector<1x16x128xf32> to vector<16x128xf32>
    %23 = vector.shape_cast %20 : vector<16x128xf32> to vector<1x16x128xf32>
    tpu.vector_store %arg7[%c0_18, %c0_19, %c0_20], %23 {strides = array<i32>} : memref<2x16x128xf32, #tpu.memory_space<vmem>>, vector<1x16x128xf32>,
    %c0_21 = arith.constant 0 : index
    %c0_22 = arith.constant 0 : index
    %24 = vector.load %arg5[%c0_21, %c0_22] : memref<16x8xf32, #tpu.memory_space<vmem>>, vector<16x8xf32>
    %cst_23 = arith.constant dense<0.000000e+00> : vector<16x128xf32>
    %25 = tpu.matmul %24, %15, %cst_23 {dimension_numbers = #tpu.dot_dimension_numbers<[1], [0], [0], [1], [0, 0, 1, 1], [], []>} : vector<16x8xf32>, vector<8x128xf32>, vector<16x128xf32> -> vector<16x128xf32>
    %c0_24 = arith.constant 0 : index
    %c0_25 = arith.constant 0 : index
    %26 = vector.load %arg6[%c0_24, %c0_25] : memref<16x1xf32, #tpu.memory_space<vmem>>, vector<16x1xf32>
    %27 = vector.broadcast %26 : vector<16x1xf32> to vector<16x128xf32>
    %28 = arith.addf %25, %27 : vector<16x128xf32>
    %c1_26 = arith.constant 1 : index
    %c0_27 = arith.constant 0 : index
    %c0_28 = arith.constant 0 : index
    %29 = vector.load %arg7[%c1_26, %c0_27, %c0_28] : memref<2x16x128xf32, #tpu.memory_space<vmem>>, vector<1x16x128xf32>
    %30 = vector.shape_cast %29 : vector<1x16x128xf32> to vector<16x128xf32>
    %31 = vector.shape_cast %28 : vector<16x128xf32> to vector<1x16x128xf32>
    tpu.vector_store %arg7[%c1_26, %c0_27, %c0_28], %31 {strides = array<i32>} : memref<2x16x128xf32, #tpu.memory_space<vmem>>, vector<1x16x128xf32>,
    return
  }
  func.func @transform_0(%arg0: i32) -> (i32, i32, i32) {
    %c0_i32 = arith.constant 0 : i32
    %c0_i32_0 = arith.constant 0 : i32
    %c0_i32_1 = arith.constant 0 : i32
    return %c0_i32, %c0_i32_0, %arg0 : i32, i32, i32
  }
  func.func @transform_1(%arg0: i32) -> (i32, i32, i32) {
    %c0_i32 = arith.constant 0 : i32
    %c0_i32_0 = arith.constant 0 : i32
    %c0_i32_1 = arith.constant 0 : i32
    return %c0_i32, %c0_i32_0, %arg0 : i32, i32, i32
  }
  func.func @transform_2(%arg0: i32) -> (i32, i32) {
    %c0_i32 = arith.constant 0 : i32
    %c0_i32_0 = arith.constant 0 : i32
    %c0_i32_1 = arith.constant 0 : i32
    return %c0_i32, %c0_i32_0 : i32, i32
  }
  func.func @transform_3(%arg0: i32) -> (i32, i32) {
    %c0_i32 = arith.constant 0 : i32
    %c0_i32_0 = arith.constant 0 : i32
    %c0_i32_1 = arith.constant 0 : i32
    return %c0_i32, %c0_i32_0 : i32, i32
  }
  func.func @transform_4(%arg0: i32) -> (i32, i32) {
    %c0_i32 = arith.constant 0 : i32
    %c0_i32_0 = arith.constant 0 : i32
    %c0_i32_1 = arith.constant 0 : i32
    return %c0_i32, %c0_i32_0 : i32, i32
  }
  func.func @transform_5(%arg0: i32) -> (i32, i32) {
    %c0_i32 = arith.constant 0 : i32
    %c0_i32_0 = arith.constant 0 : i32
    %c0_i32_1 = arith.constant 0 : i32
    return %c0_i32, %c0_i32_0 : i32, i32
  }
  func.func @transform_6(%arg0: i32) -> (i32, i32, i32) {
    %c0_i32 = arith.constant 0 : i32
    %c0_i32_0 = arith.constant 0 : i32
    %c0_i32_1 = arith.constant 0 : i32
    return %c0_i32, %c0_i32_0, %arg0 : i32, i32, i32
  }
}

</mosaic_0001>

<bundles_post_ra>
// kernel: encoderx2_forward.1
= control target key start
LH: loop header
LB: loop body
LE: loop exit
PB: predicated region body
PF: predicated region fallthrough
CT: control target
= control target key end

     0   :  { %vm153_vm0 = vcmask 64512   ;;  %vm51_vm1 = vcmask 31744   ;;  %v272_v3 = vmov 0   ;;  %vm58_vm2 = vcmask 1043456   ;;  %s366_s1 = inlined_call_operand.vmem [shape: f32[2,8,128], index: 1, kind: input, shape index: {}]   ;;  %s367_s4 = inlined_call_operand.vmem [shape: f32[16,8], index: 4, kind: input, shape index: {}]   ;;  %s368_s0 = inlined_call_operand.vmem [shape: f32[4,4,128], index: 0, kind: input, shape index: {}]   ;;  %s369_s2 = inlined_call_operand.vmem [shape: f32[16,4], index: 2, kind: input, shape index: {}]   ;;  %s370_s5 = inlined_call_operand.vmem [shape: f32[16,1], index: 5, kind: input, shape index: {}]   ;;  %s371_s3 = inlined_call_operand.vmem [shape: f32[16,1], index: 3, kind: input, shape index: {}]   ;;  %s372_s6 = inlined_call_operand.vmem [shape: f32[2,16,128], index: 6, kind: output, shape index: {}]  }
   0x1   :  { %v33_v0 = vld [vmem:[%s366_s1] sm:$0xff]  ;;  %v245_v1 = vld [vmem:[%s366_s1 + $0x8] sm:$0xff]  ;;  %271 = vset.pattern.permute.xlu1 %v272_v3  ;;  %270 = vset.pattern.permute.xlu0 %v272_v3 }
   0x2   :  { %v139_v2 = vld [vmem:[%s367_s4] sm:$0xff]  ;;  %v36_v4 = vmax.f32 %v33_v0, %v245_v1  ;;  %v140_v5 = vld [vmem:[%s367_s4 + $0x8] sm:$0xff] }
   0x3   :  { %266 = vmatprep.mubr.msk.f32.mxu1 %vm153_vm0, %v139_v2  ;;  %v23_v6 = vld [vmem:[%s368_s0] sm:$0xf]  ;;  %v242_v7 = vld [vmem:[%s368_s0 + $0x4] sm:$0xf]  ;;  %v243_v8 = vld [vmem:[%s368_s0 + $0x8] sm:$0xf] }
   0x4   :  { %v244_v9 = vld [vmem:[%s368_s0 + $0xc] sm:$0xf]  ;;  %v30_v10 = vmax.f32 %v23_v6, %v242_v7  ;;  %v37_v11 = vld [vmem:[%s369_s2] sm:$0xff]  ;;  %264 = vmatprep.subr.mxu1 %v36_v4 }
   0x5   :  { %v31_v12 = vmax.f32 %v243_v8, %v244_v9  ;;  %261 = vmatprep.mubr.msk.f32.mxu0 %vm51_vm1, %v37_v11  ;;  %v141_v13 = vld [vmem:[%s370_s5] sm:$0xff]  ;;  %265 = vmatpush3.msra.mxu1 %v36_v4  ;;  %v142_v16 = vld [vmem:[%s370_s5 + $0x8] sm:$0xff] }
   0x6   :  { %v39_v14 = vld [vmem:[%s371_s3] sm:$0xff]  ;;  %145 = vperm.xlu1 %271, %v141_v13   ;;  %267 = vmatmul.mubr.msk.f32.vlgmr.msra.gmra.mrb[0].mxu1 %vm153_vm0, %v140_v5  ;;  %v38_v17 = vld [vmem:[%s369_s2 + $0x8] sm:$0xff] }
   0x7   :  { %v32_v15 = vmax.f32 %v30_v10, %v31_v12  ;;  %43 = vperm.xlu0 %270, %v39_v14   ;;  %v40_v18 = vld [vmem:[%s371_s3 + $0x8] sm:$0xff] }
   0x9   :  { %259 = vmatprep.subr.msk.mxu0 %vm58_vm2, %v32_v15 }
   0xa   :  { %260 = vmatpush3.msk.msra.mxu0 %vm58_vm2, %v32_v15  ;;  %150 = vperm.xlu1 %271, %v142_v16  }
   0xb   :  { %262 = vmatmul.mubr.msk.f32.vlgmr.msra.gmra.mrb[0].mxu0 %vm51_vm1, %v38_v17  ;;  %48 = vperm.xlu0 %270, %v40_v18  }
  0x85   :  { %v146_v19 = vpop.permute.xlu1 %145 }
  0x86   :  { %v44_v20 = vpop.permute.xlu0 %43 }
  0x89   :  { %v151_v21 = vpop.permute.xlu1 %150 }
  0x8a   :  { %v49_v26 = vpop.permute.xlu0 %48 }
  0xd9   :  { %v268_v22 = vpop.f32.mrb[0].mxu1 }
  0xda   :  { %v232_v23 = vadd.f32 %v268_v22, %v151_v21  ;;  %v226_v24 = vpop.f32.mrb[1].mxu1 }
  0xdb   :  { %v227_v25 = vadd.f32 %v226_v24, %v146_v19 }
  0xdc   :  { %252 = vst [vmem:[%s372_s6 + $0x18] sm:$0xff] %v232_v23 }
  0xdd   :  { %251 = vst [vmem:[%s372_s6 + $0x10] sm:$0xff] %v227_v25 }
  0xde   :  { %v263_v27 = vpop.f32.mrb[0].mxu0 }
  0xdf   :  { %v134_v28 = vadd.f32 %v263_v27, %v49_v26  ;;  %v128_v29 = vpop.f32.mrb[1].mxu0 }
  0xe0   :  { %v129_v30 = vadd.f32 %v128_v29, %v44_v20 }
  0xe1   :  { %138 = vst [vmem:[%s372_s6 + $0x8] sm:$0xff] %v134_v28 }
  0xe2   :  { %137 = vst [vmem:[%s372_s6] sm:$0xff] %v129_v30 }

</bundles_post_ra>
